<compile_context>
chip_gen: v7x
topology: tpu7x:2x2x1
jax: 0.10.0
libtpu: 0.0.40
codegen_flags: <defaults>
</compile_context>

<pallas_src>
import functools

import jax
import jax.numpy as jnp
from jax import lax
from jax.experimental import pallas as pl
from jax.experimental.pallas import tpu as pltpu

NEG_SLOPE = 0.2        # DGL GATConv default leaky-relu slope
MASK_VAL = -1e30       # "no edge" logit; exp(MASK_VAL - m) underflows to 0


def _round_up(x, m):
  return (x + m - 1) // m * m


def _vmem_limit():
  """Budget-aware scoped-VMEM limit (v5e/v6e: 128 MiB phys, v7x: 64 MiB/TC)."""
  try:
    cap = pltpu.get_tpu_info().vmem_capacity_bytes
  except Exception:  # no device / API mismatch -> conservative default
    cap = 64 * 1024 * 1024
  return max(32 * 1024 * 1024, min(int(cap * 0.8), 112 * 1024 * 1024))


def _pick_tile(n_pad, resident_bytes, vmem_budget):
  """Largest dst-node tile whose double-buffered int8 adjacency block plus the
  resident arrays fit comfortably in the scoped VMEM budget."""
  for t in (512, 256, 128):
    if n_pad % t == 0 and resident_bytes + 3 * t * n_pad <= int(vmem_budget * 0.6):
      return t
  # TODO(synk): for N so large that the resident z itself nears the budget,
  # switch to a source-chunk ("arbitrary") grid axis with online softmax.
  return 128


def _resident_spec(arr):
  """Whole array as one block; constant index_map keeps it resident (no
  re-DMA) across the destination-tile grid."""
  nd = arr.ndim
  return pl.BlockSpec(arr.shape, lambda i: (0,) * nd)


def _attn_block(attn, d):
  """(H, D) attention vector -> (H, H*D) block matrix so that
  z @ blk.T / blk @ z.T give the per-head attention projections."""
  h = attn.shape[0]
  eye = jnp.eye(h, dtype=attn.dtype)
  return (eye[:, :, None] * attn[:, None, :]).reshape(h, h * d)


# --------------------------- projection kernel -------------------------------
def _proj_kernel(h_ref, w_ref, al_ref, ar_ref, z_ref, elT_ref, er_ref):
  z = jnp.dot(h_ref[...], w_ref[...], preferred_element_type=jnp.float32)
  z_ref[...] = z.astype(jnp.bfloat16)
  # elT[h, u] = a_l[h] . z[u, head h block]   (lane-dense rows for the kernel)
  elT_ref[...] = lax.dot_general(al_ref[...], z, (((1,), (1,)), ((), ())),
                                 preferred_element_type=jnp.float32)
  # er[v, h]  = a_r[h] . z[v, head h block]
  er_ref[...] = jnp.dot(z, ar_ref[...], preferred_element_type=jnp.float32)


def gat_project(h_b, w_b, al_blk, ar_blkT, *, tile, vmem_limit):
  n, fin = h_b.shape
  fout = w_b.shape[1]
  nh = al_blk.shape[0]
  return pl.pallas_call(
      _proj_kernel,
      out_shape=(jax.ShapeDtypeStruct((n, fout), jnp.bfloat16),
                 jax.ShapeDtypeStruct((nh, n), jnp.float32),
                 jax.ShapeDtypeStruct((n, nh), jnp.float32)),
      grid_spec=pltpu.PrefetchScalarGridSpec(
          num_scalar_prefetch=0,
          grid=(n // tile,),
          in_specs=[pl.BlockSpec((tile, fin), lambda i: (i, 0)),
                    _resident_spec(w_b),
                    _resident_spec(al_blk),
                    _resident_spec(ar_blkT)],
          out_specs=(pl.BlockSpec((tile, fout), lambda i: (i, 0)),
                     pl.BlockSpec((nh, tile), lambda i: (0, i)),
                     pl.BlockSpec((tile, nh), lambda i: (i, 0)))),
      compiler_params=pltpu.CompilerParams(
          dimension_semantics=("parallel",),
          vmem_limit_bytes=vmem_limit),
  )(h_b, w_b, al_blk, ar_blkT)


# ----------------------------- attention kernel ------------------------------
def _gat_attn_kernel(elT_ref, er_ref, z_ref, b_ref, adj_ref, *rest,
                     num_heads, out_feats, epilogue):
  if epilogue == "proj":
    wn_ref, aln_ref, arn_ref, zo_ref, elo_ref, ero_ref = rest
  else:
    w1_ref, b1_ref, w2_ref, b2_ref, out_ref = rest

  mask = adj_ref[...] > 0                                   # (T, N) bool from int8

  heads = []
  for hd in range(num_heads):
    lo = hd * out_feats
    el_row = elT_ref[hd:hd + 1, :]                          # (1, N) hoisted src term
    er_col = er_ref[:, hd:hd + 1]                           # (T, 1) hoisted dst term
    e = er_col + el_row                                     # (T, N) logits
    e = jnp.where(e > 0, e, NEG_SLOPE * e)                  # LeakyReLU(0.2)
    e = jnp.where(mask, e, MASK_VAL)                        # single masking select
    m = jnp.max(e, axis=-1, keepdims=True)
    p = jnp.exp(e - m)                                      # masked -> underflow to 0
    denom = jnp.maximum(jnp.sum(p, axis=-1, keepdims=True), 1e-20)
    zh = z_ref[:, lo:lo + out_feats]                        # (N, D) bf16 src features
    head = jnp.dot(p.astype(jnp.bfloat16), zh,
                   preferred_element_type=jnp.float32)      # (T, D) unnormalized
    heads.append(head * pl.reciprocal(denom, approx=True))  # normalize post-agg

  # concat heads once (== flatten(1)), GATConv bias + ReLU in one pass
  hid = jnp.maximum(jnp.concatenate(heads, axis=-1) + b_ref[...], 0.0)
  hid_b = hid.astype(jnp.bfloat16)

  if epilogue == "proj":
    # fused fc of the *next* GAT layer + its hoisted attention projections
    zn = jnp.dot(hid_b, wn_ref[...], preferred_element_type=jnp.float32)
    zo_ref[...] = zn.astype(jnp.bfloat16)
    elo_ref[...] = lax.dot_general(aln_ref[...], zn, (((1,), (1,)), ((), ())),
                                   preferred_element_type=jnp.float32)
    ero_ref[...] = jnp.dot(zn, arn_ref[...], preferred_element_type=jnp.float32)
  else:
    # fused 2-layer MLP head (classes padded to a lane-dense width)
    x = jnp.dot(hid_b, w1_ref[...], preferred_element_type=jnp.float32) + b1_ref[...]
    x = jnp.maximum(x, 0.0)
    out_ref[...] = jnp.dot(x.astype(jnp.bfloat16), w2_ref[...],
                           preferred_element_type=jnp.float32) + b2_ref[...]


def gat_attention(z, elT, er, bias, adj_i8, epi_args, *, num_heads, out_feats,
                  epilogue, tile, vmem_limit):
  n = z.shape[0]
  nh = num_heads
  kernel = functools.partial(_gat_attn_kernel, num_heads=num_heads,
                             out_feats=out_feats, epilogue=epilogue)
  in_specs = [_resident_spec(elT),
              pl.BlockSpec((tile, nh), lambda i: (i, 0)),     # er dst tile
              _resident_spec(z),
              _resident_spec(bias),
              pl.BlockSpec((tile, n), lambda i: (i, 0))]      # int8 adj dst tile
  in_specs += [_resident_spec(a) for a in epi_args]

  if epilogue == "proj":
    fout = epi_args[0].shape[1]
    out_shape = (jax.ShapeDtypeStruct((n, fout), jnp.bfloat16),
                 jax.ShapeDtypeStruct((nh, n), jnp.float32),
                 jax.ShapeDtypeStruct((n, nh), jnp.float32))
    out_specs = (pl.BlockSpec((tile, fout), lambda i: (i, 0)),
                 pl.BlockSpec((nh, tile), lambda i: (0, i)),
                 pl.BlockSpec((tile, nh), lambda i: (i, 0)))
  else:
    c = epi_args[2].shape[1]
    out_shape = jax.ShapeDtypeStruct((n, c), jnp.float32)
    out_specs = pl.BlockSpec((tile, c), lambda i: (i, 0))

  return pl.pallas_call(
      kernel,
      out_shape=out_shape,
      grid_spec=pltpu.PrefetchScalarGridSpec(
          num_scalar_prefetch=0,
          grid=(n // tile,),
          in_specs=in_specs,
          out_specs=out_specs),
      compiler_params=pltpu.CompilerParams(
          dimension_semantics=("parallel",),     # megacore splits dst tiles
          vmem_limit_bytes=vmem_limit),
  )(elT, er, z, bias, adj_i8, *epi_args)


# --------------------------------- Full GAT ----------------------------------
def gat_forward(adj, h, params, *, num_heads, out_feats):
  n, fin = h.shape
  n_classes = params["w2"].shape[1]
  hdim = num_heads * out_feats

  n_pad = _round_up(n, 128)
  vmem_limit = _vmem_limit()
  resident = (n_pad * hdim * 2              # bf16 z
              + 2 * n_pad * num_heads * 4   # elT + er
              + (1 << 20))                  # weights / slack
  tile = _pick_tile(n_pad, resident, vmem_limit)

  # host-side padding: rows padded with zeros, adjacency padded with no edges
  h_p = jnp.zeros((n_pad, fin), jnp.bfloat16).at[:n].set(h.astype(jnp.bfloat16))
  adj_p = jnp.zeros((n_pad, n_pad), jnp.int8).at[:n, :n].set(adj.astype(jnp.int8))

  layers = params["gat_layers"]
  preps = []
  for layer in layers:
    preps.append((layer["w"].astype(jnp.bfloat16),
                  _attn_block(layer["attn_l"], out_feats),       # (H, H*D)
                  _attn_block(layer["attn_r"], out_feats).T,     # (H*D, H)
                  layer["bias"]))

  # MLP head: pad classes to a lane-dense width, slice afterwards
  c_pad = _round_up(n_classes, 128)
  w2_p = jnp.zeros((params["w2"].shape[0], c_pad), jnp.float32)
  w2_p = w2_p.at[:, :n_classes].set(params["w2"]).astype(jnp.bfloat16)
  b2_p = jnp.zeros((1, c_pad), jnp.float32).at[:, :n_classes].set(params["b2"])
  w1_b = params["w1"].astype(jnp.bfloat16)
  b1 = params["b1"]

  # layer-0 fc + hoisted attention projections
  w0, al0, ar0, _ = preps[0]
  z, elT, er = gat_project(h_p, w0, al0, ar0, tile=tile, vmem_limit=vmem_limit)

  out = None
  for li in range(len(layers)):
    bias = preps[li][3]
    if li + 1 < len(layers):
      wn, aln, arn, _ = preps[li + 1]
      z, elT, er = gat_attention(z, elT, er, bias, adj_p, (wn, aln, arn),
                                 num_heads=num_heads, out_feats=out_feats,
                                 epilogue="proj", tile=tile,
                                 vmem_limit=vmem_limit)
    else:
      out = gat_attention(z, elT, er, bias, adj_p, (w1_b, b1, w2_p, b2_p),
                          num_heads=num_heads, out_feats=out_feats,
                          epilogue="mlp", tile=tile, vmem_limit=vmem_limit)
  return out[:n, :n_classes]


def init_params(key, in_feats, n_hidden, n_classes, n_layers, num_heads):
  def nrm(k, shape, scale=0.1):
    return scale * jax.random.normal(k, shape, jnp.float32)

  keys = jax.random.split(key, 4 * n_layers + 4)
  layers = []
  for i in range(n_layers):
    k0, k1, k2, k3 = keys[4 * i:4 * i + 4]
    layers.append(dict(
        w=nrm(k0, (in_feats, num_heads * n_hidden)),
        attn_l=nrm(k1, (num_heads, n_hidden)),
        attn_r=nrm(k2, (num_heads, n_hidden)),
        bias=nrm(k3, (1, num_heads * n_hidden)),
    ))
  kw1, kb1, kw2, kb2 = keys[4 * n_layers:]
  return dict(
      gat_layers=layers,
      w1=nrm(kw1, (n_hidden * num_heads, n_hidden // 2)),
      b1=nrm(kb1, (1, n_hidden // 2)),
      w2=nrm(kw2, (n_hidden // 2, n_classes)),
      b2=nrm(kb2, (1, n_classes)),
  )


if __name__ == "__main__":
  # The reference module feeds layer-2 the output of layer-1 while both layers
  # are declared with `in_feats` inputs, so pick in_feats == n_hidden*num_heads
  # to make that wiring shape-consistent.
  N = 16
  n_hidden = 8
  num_heads = 2
  in_feats = n_hidden * num_heads   # 16
  n_classes = 4
  n_layers = 2

  key = jax.random.PRNGKey(0)
  k_params, k_feat, k_adj = jax.random.split(key, 3)

  params = init_params(k_params, in_feats, n_hidden, n_classes, n_layers, num_heads)

  h = jax.random.normal(k_feat, (N, in_feats), jnp.float32)
  # Random sparse directed graph + self-loops (avoids zero-in-degree nodes,
  # which keeps the single-select masking path exact).
  # adj[dst, src] = 1 iff edge src->dst; shipped as int8 (mask-only traffic).
  adj = (jax.random.uniform(k_adj, (N, N)) < 0.3).astype(jnp.int8)
  adj = jnp.maximum(adj, jnp.eye(N, dtype=jnp.int8))

  out = gat_forward(adj, h, params, num_heads=num_heads, out_feats=n_hidden)
  out = jax.block_until_ready(out)
  assert out.shape == (N, n_classes) and out.dtype == jnp.float32
  print("KERNEL_OK")
</pallas_src>

<mosaic_0001>
module attributes {stable_mosaic.version = 11 : i64} {
  func.func @_proj_kernel(%arg0: i32, %arg1: memref<128x16xbf16, #tpu.memory_space<vmem>>, %arg2: memref<16x16xbf16, #tpu.memory_space<vmem>>, %arg3: memref<2x16xf32, #tpu.memory_space<vmem>>, %arg4: memref<16x2xf32, #tpu.memory_space<vmem>>, %arg5: memref<128x16xbf16, #tpu.memory_space<vmem>>, %arg6: memref<2x128xf32, #tpu.memory_space<vmem>>, %arg7: memref<128x2xf32, #tpu.memory_space<vmem>>) attributes {dimension_semantics = [#tpu.dimension_semantics<parallel>], iteration_bounds = array<i64: 1>, scalar_prefetch = 0 : i64, scratch_operands = 0 : i64, tpu.core_type = #tpu.core_type<tc>, window_params = [{transform_indices = @transform_0, window_bounds = array<i64: 128, 16>}, {pipeline_mode = #tpu.pipeline_mode<synchronous>, transform_indices = @transform_1, window_bounds = array<i64: 16, 16>}, {pipeline_mode = #tpu.pipeline_mode<synchronous>, transform_indices = @transform_2, window_bounds = array<i64: 2, 16>}, {pipeline_mode = #tpu.pipeline_mode<synchronous>, transform_indices = @transform_3, window_bounds = array<i64: 16, 2>}, {transform_indices = @transform_4, window_bounds = array<i64: 128, 16>}, {transform_indices = @transform_5, window_bounds = array<i64: 2, 128>}, {transform_indices = @transform_6, window_bounds = array<i64: 128, 2>}]} {
    %c0 = arith.constant 0 : index
    %c0_0 = arith.constant 0 : index
    %0 = vector.load %arg1[%c0, %c0_0] : memref<128x16xbf16, #tpu.memory_space<vmem>>, vector<128x16xbf16>
    %c0_1 = arith.constant 0 : index
    %c0_2 = arith.constant 0 : index
    %1 = vector.load %arg2[%c0_1, %c0_2] : memref<16x16xbf16, #tpu.memory_space<vmem>>, vector<16x16xbf16>
    %cst = arith.constant dense<0.000000e+00> : vector<128x16xf32>
    %2 = tpu.matmul %0, %1, %cst {dimension_numbers = #tpu.dot_dimension_numbers<[1], [0], [0], [1], [0, 0, 1, 1], [], []>} : vector<128x16xbf16>, vector<16x16xbf16>, vector<128x16xf32> -> vector<128x16xf32>
    %3 = arith.truncf %2 : vector<128x16xf32> to vector<128x16xbf16>
    %c0_3 = arith.constant 0 : index
    %c0_4 = arith.constant 0 : index
    %4 = vector.load %arg5[%c0_3, %c0_4] : memref<128x16xbf16, #tpu.memory_space<vmem>>, vector<128x16xbf16>
    tpu.vector_store %arg5[%c0_3, %c0_4], %3 {strides = array<i32>} : memref<128x16xbf16, #tpu.memory_space<vmem>>, vector<128x16xbf16>,
    %c0_5 = arith.constant 0 : index
    %c0_6 = arith.constant 0 : index
    %5 = vector.load %arg3[%c0_5, %c0_6] : memref<2x16xf32, #tpu.memory_space<vmem>>, vector<2x16xf32>
    %cst_7 = arith.constant dense<0.000000e+00> : vector<2x128xf32>
    %6 = tpu.matmul %5, %2, %cst_7 {dimension_numbers = #tpu.dot_dimension_numbers<[1], [1], [0], [0], [0, 0, 1, 0], [], []>} : vector<2x16xf32>, vector<128x16xf32>, vector<2x128xf32> -> vector<2x128xf32>
    %c0_8 = arith.constant 0 : index
    %c0_9 = arith.constant 0 : index
    %7 = vector.load %arg6[%c0_8, %c0_9] : memref<2x128xf32, #tpu.memory_space<vmem>>, vector<2x128xf32>
    tpu.vector_store %arg6[%c0_8, %c0_9], %6 {strides = array<i32>} : memref<2x128xf32, #tpu.memory_space<vmem>>, vector<2x128xf32>,
    %c0_10 = arith.constant 0 : index
    %c0_11 = arith.constant 0 : index
    %8 = vector.load %arg4[%c0_10, %c0_11] : memref<16x2xf32, #tpu.memory_space<vmem>>, vector<16x2xf32>
    %cst_12 = arith.constant dense<0.000000e+00> : vector<128x2xf32>
    %9 = tpu.matmul %2, %8, %cst_12 {dimension_numbers = #tpu.dot_dimension_numbers<[1], [0], [0], [1], [0, 0, 1, 1], [], []>} : vector<128x16xf32>, vector<16x2xf32>, vector<128x2xf32> -> vector<128x2xf32>
    %c0_13 = arith.constant 0 : index
    %c0_14 = arith.constant 0 : index
    %10 = vector.load %arg7[%c0_13, %c0_14] : memref<128x2xf32, #tpu.memory_space<vmem>>, vector<128x2xf32>
    tpu.vector_store %arg7[%c0_13, %c0_14], %9 {strides = array<i32>} : memref<128x2xf32, #tpu.memory_space<vmem>>, vector<128x2xf32>,
    return
  }
  func.func @transform_0(%arg0: i32) -> (i32, i32) {
    %c0_i32 = arith.constant 0 : i32
    %c0_i32_0 = arith.constant 0 : i32
    return %arg0, %c0_i32 : i32, i32
  }
  func.func @transform_1(%arg0: i32) -> (i32, i32) {
    %c0_i32 = arith.constant 0 : i32
    %c0_i32_0 = arith.constant 0 : i32
    %c0_i32_1 = arith.constant 0 : i32
    return %c0_i32, %c0_i32_0 : i32, i32
  }
  func.func @transform_2(%arg0: i32) -> (i32, i32) {
    %c0_i32 = arith.constant 0 : i32
    %c0_i32_0 = arith.constant 0 : i32
    %c0_i32_1 = arith.constant 0 : i32
    return %c0_i32, %c0_i32_0 : i32, i32
  }
  func.func @transform_3(%arg0: i32) -> (i32, i32) {
    %c0_i32 = arith.constant 0 : i32
    %c0_i32_0 = arith.constant 0 : i32
    %c0_i32_1 = arith.constant 0 : i32
    return %c0_i32, %c0_i32_0 : i32, i32
  }
  func.func @transform_4(%arg0: i32) -> (i32, i32) {
    %c0_i32 = arith.constant 0 : i32
    %c0_i32_0 = arith.constant 0 : i32
    return %arg0, %c0_i32 : i32, i32
  }
  func.func @transform_5(%arg0: i32) -> (i32, i32) {
    %c0_i32 = arith.constant 0 : i32
    %c0_i32_0 = arith.constant 0 : i32
    return %c0_i32, %arg0 : i32, i32
  }
  func.func @transform_6(%arg0: i32) -> (i32, i32) {
    %c0_i32 = arith.constant 0 : i32
    %c0_i32_0 = arith.constant 0 : i32
    return %arg0, %c0_i32 : i32, i32
  }
}

</mosaic_0001>

<bundles_post_ra>
// kernel: tpu_custom_call.1
= control target key start
LH: loop header
LB: loop body
LE: loop exit
PB: predicated region body
PF: predicated region fallthrough
CT: control target
= control target key end

     0   :  { %vm86_vm0 = vcmask 130048   ;;  %s1148_s0 = inlined_call_operand.vmem [shape: bf16[128,16], index: 0, kind: input, shape index: {}]   ;;  %s1149_s1 = inlined_call_operand.vmem [shape: bf16[16,16], index: 1, kind: input, shape index: {}]   ;;  %s1150_s2 = inlined_call_operand.vmem [shape: f32[2,16], index: 2, kind: input, shape index: {}]   ;;  %s1151_s3 = inlined_call_operand.vmem [shape: f32[16,2], index: 3, kind: input, shape index: {}]   ;;  %s1152_s4 = inlined_call_operand.vmem [shape: bf16[128,16], index: 4, kind: output, shape index: {0}]   ;;  %s1153_s5 = inlined_call_operand.hbm [shape: f32[2,128], index: 5, kind: output, shape index: {1}]   ;;  %s1154_s6 = inlined_call_operand.vmem [shape: f32[128,2], index: 6, kind: output, shape index: {2}]  }
   0x1   :  { %v845_v0 = vld [vmem:[%s1149_s1] sm:$0xff]   ;;  %v847_v2 = vld [vmem:[%s1148_s0 + $0x8] sm:$0xff]   ;;  %v848_v3 = vld [vmem:[%s1148_s0 + $0x10] sm:$0xff]  }
   0x2   :  { %v846_v1 = vld [vmem:[%s1148_s0] sm:$0xff]   ;;  %724 = vmatprep.subr.bf16.mxu0 %v845_v0 }
   0x3   :  { %725 = vmatpush3.bf16.msra.mxu0 %v845_v0  ;;  %726 = vmatprep.mubr.msk.bf16.mxu0 %vm86_vm0, %v846_v1 }
   0x6   :  { %727 = vmatmul.mubr.msk.bf16.vlgmr.msra.gmra.mrb[0].mxu0 %vm86_vm0, %v847_v2 }
   0x7   :  { %730 = vmatprep.mubr.msk.bf16.mxu0 %vm86_vm0, %v848_v3 }
   0x8   :  { %12 = vsyncpa [#allocation3], 0  ;;  %v849_v4 = vld [vmem:[%s1148_s0 + $0x18] sm:$0xff]   ;;  %v850_v5 = vld [vmem:[%s1148_s0 + $0x20] sm:$0xff]   ;;  %v878_v12 = vmov 0.0|0.0   ;;  %vm879_vm1 = vmmov 0  }
   0x9   :  { %v851_v6 = vld [vmem:[%s1148_s0 + $0x28] sm:$0xff]   ;;  %v852_v7 = vld [vmem:[%s1148_s0 + $0x30] sm:$0xff]   ;;  %v853_v8 = vld [vmem:[%s1148_s0 + $0x38] sm:$0xff]   ;;  %805 = vmatprep.subr.bf16.mxu1 %v878_v12  ;;  %v880_v13 = vmov 0.0   ;;  %vm272_vm2 = vcmask 125952   ;;  %vm559_vm4 = vcmask 15360  }
   0xa   :  { %v412_v9 = vld [vmem:[%s1151_s3] sm:$0xff]  ;;  %v413_v10 = vld [vmem:[%s1151_s3 + $0x8] sm:$0xff]  ;;  %774 = vmatprep.mubr.msk.f32.mxu1 %vm879_vm1, %v880_v13  ;;  %vm966_vm3 = vmpackc.low %vm86_vm0, %vm86_vm0  ;;  %s881_s25 = smov [#allocation2]  }
   0xb   :  { %v837_v11 = vpack.c.bf16 %v413_v10, %v412_v9  ;;  %v289_v55 = vld [vmem:[%s1150_s2] sm:$0x3]  ;;  %s584_s26 = sshll.u32 %s881_s25, 4  ;;  %s585_s26 = int_to_ptr.vmem [resolvable:$true] %s584_s26 }
   0xc   :  { %s854_s27 = scalar_lea.vmem %s585_s26, 32  ;;  %p859_p1 = scmp.lt.s32.totalorder %s585_s26, %s585_s26 }
   0xd   :  { %838 = vmatprep.subr.bf16.mxu0 %v837_v11  ;;  %p855_p0 = scmp.ne.s32.totalorder %s585_s26, %s854_s27  ;;  %p860_p2 = scmp.lt.s32.totalorder %s854_s27, %s854_s27 }
   0xe   :  { %731 = vmatmul.mubr.msk.bf16.gmra.mrb[4].mxu0 %vm86_vm0, %v849_v4 }
   0xf   :  { %734 = vmatprep.mubr.msk.bf16.mxu0 %vm86_vm0, %v850_v5  ;;  %840 = vmatpush3.bf16.msra.mxu0 %v837_v11  ;;  %p861_p3 = por %p860_p2, %p859_p1 }
  0x11   :  { %p862_p4 = pnand %p861_p3, %p855_p0 }
  0x16   :  { %735 = vmatmul.mubr.msk.bf16.gmra.mrb[8].mxu0 %vm86_vm0, %v851_v6 }
  0x17   :  { %738 = vmatprep.mubr.msk.bf16.mxu0 %vm86_vm0, %v852_v7 }
  0x1e   :  { %739 = vmatmul.mubr.msk.bf16.gmra.mrb[12].mxu0 %vm86_vm0, %v853_v8 }
  0xd9   :  { %v728_v14 = vpop.f32.mrb[0].mxu0 }
  0xda   :  { %v666_v15 = vpack.c.bf16 %v728_v14, %v728_v14  ;;  %v145_v16 = vpop.f32.mrb[1].mxu0 }
  0xdb   :  { %v664_v17 = vpack.c.bf16 %v145_v16, %v145_v16  ;;  %v729_v18 = vpop.f32.mrb[2].mxu0  ;;  %781 = vmatprep.mubr.msk.f32.mxu0 %vm86_vm0, %v145_v16 }
  0xdc   :  { %275 = vst.msk [vmem:[%s1152_s4 + $0x8] sm:$0xf] %vm272_vm2, %v666_v15  ;;  %v667_v19 = vpack.c.bf16 %v729_v18, %v729_v18  ;;  %v810_v20 = vpack.c.bf16 %v729_v18, %v728_v14  ;;  %v148_v21 = vpop.f32.mrb[3].mxu0 }
  0xdd   :  { %273 = vst.msk [vmem:[%s1152_s4] sm:$0xf] %vm272_vm2, %v664_v17  ;;  %v665_v23 = vpack.c.bf16 %v148_v21, %v148_v21  ;;  %v806_v24 = vpack.c.bf16 %v148_v21, %v145_v16  ;;  %782 = vmatmul.mubr.msk.f32.vlgmr.msra.gmra.mrb[16].mxu0 %vm86_vm0, %v148_v21 }
  0xde   :  { %276 = vst.msk [vmem:[%s1152_s4 + $0xc] sm:$0xf] %vm272_vm2, %v667_v19  ;;  %784 = vmatprep.mubr.msk.f32.mxu0 %vm86_vm0, %v728_v14 }
  0xdf   :  { %274 = vst.msk [vmem:[%s1152_s4 + $0x4] sm:$0xf] %vm272_vm2, %v665_v23  ;;  %808 = vmatpush3.bf16.xpose.msk.msra.mxu1 %vm966_vm3, %v806_v24 }
  0xe0   :  { %809 = vmatprep.subr.bf16.mxu1 %v878_v12 }
  0xe1   :  { %v732_v25 = vpop.f32.mrb[4].mxu0  ;;  %785 = vmatmul.mubr.msk.f32.gmra.mrb[18].mxu0 %vm86_vm0, %v729_v18 }
  0xe2   :  { %v670_v26 = vpack.c.bf16 %v732_v25, %v732_v25  ;;  %v161_v27 = vpop.f32.mrb[5].mxu0 }
  0xe3   :  { %v668_v28 = vpack.c.bf16 %v161_v27, %v161_v27  ;;  %v733_v29 = vpop.f32.mrb[6].mxu0  ;;  %787 = vmatprep.mubr.msk.f32.mxu0 %vm86_vm0, %v161_v27 }
  0xe4   :  { %279 = vst.msk [vmem:[%s1152_s4 + $0x18] sm:$0xf] %vm272_vm2, %v670_v26  ;;  %v671_v30 = vpack.c.bf16 %v733_v29, %v733_v29  ;;  %v818_v31 = vpack.c.bf16 %v733_v29, %v732_v25  ;;  %v164_v32 = vpop.f32.mrb[7].mxu0 }
  0xe5   :  { %277 = vst.msk [vmem:[%s1152_s4 + $0x10] sm:$0xf] %vm272_vm2, %v668_v28  ;;  %v669_v33 = vpack.c.bf16 %v164_v32, %v164_v32  ;;  %v814_v34 = vpack.c.bf16 %v164_v32, %v161_v27  ;;  %788 = vmatmul.mubr.msk.f32.gmra.mrb[20].mxu0 %vm86_vm0, %v164_v32 }
  0xe6   :  { %280 = vst.msk [vmem:[%s1152_s4 + $0x1c] sm:$0xf] %vm272_vm2, %v671_v30  ;;  %790 = vmatprep.mubr.msk.f32.mxu0 %vm86_vm0, %v732_v25 }
  0xe7   :  { %278 = vst.msk [vmem:[%s1152_s4 + $0x14] sm:$0xf] %vm272_vm2, %v669_v33  ;;  %812 = vmatpush3.bf16.xpose.msk.msra.mxu1 %vm966_vm3, %v810_v20 }
  0xe8   :  { %813 = vmatprep.subr.bf16.mxu1 %v878_v12 }
  0xe9   :  { %791 = vmatmul.mubr.msk.f32.gmra.mrb[22].mxu0 %vm86_vm0, %v733_v29  ;;  %v736_v35 = vpop.f32.mrb[8].mxu0 }
  0xea   :  { %v674_v36 = vpack.c.bf16 %v736_v35, %v736_v35  ;;  %v177_v37 = vpop.f32.mrb[9].mxu0 }
  0xeb   :  { %v672_v38 = vpack.c.bf16 %v177_v37, %v177_v37  ;;  %v737_v39 = vpop.f32.mrb[10].mxu0  ;;  %793 = vmatprep.mubr.msk.f32.mxu0 %vm86_vm0, %v177_v37 }
  0xec   :  { %283 = vst.msk [vmem:[%s1152_s4 + $0x28] sm:$0xf] %vm272_vm2, %v674_v36  ;;  %v675_v40 = vpack.c.bf16 %v737_v39, %v737_v39  ;;  %v826_v41 = vpack.c.bf16 %v737_v39, %v736_v35  ;;  %v180_v42 = vpop.f32.mrb[11].mxu0 }
  0xed   :  { %281 = vst.msk [vmem:[%s1152_s4 + $0x20] sm:$0xf] %vm272_vm2, %v672_v38  ;;  %v673_v43 = vpack.c.bf16 %v180_v42, %v180_v42  ;;  %v822_v44 = vpack.c.bf16 %v180_v42, %v177_v37  ;;  %794 = vmatmul.mubr.msk.f32.gmra.mrb[24].mxu0 %vm86_vm0, %v180_v42 }
  0xee   :  { %284 = vst.msk [vmem:[%s1152_s4 + $0x2c] sm:$0xf] %vm272_vm2, %v675_v40  ;;  %796 = vmatprep.mubr.msk.f32.mxu0 %vm86_vm0, %v736_v35 }
  0xef   :  { %816 = vmatpush3.bf16.xpose.msk.msra.mxu1 %vm966_vm3, %v814_v34  ;;  %282 = vst.msk [vmem:[%s1152_s4 + $0x24] sm:$0xf] %vm272_vm2, %v673_v43 }
  0xf0   :  { %817 = vmatprep.subr.bf16.mxu1 %v878_v12 }
  0xf1   :  { %797 = vmatmul.mubr.msk.f32.gmra.mrb[26].mxu0 %vm86_vm0, %v737_v39  ;;  %v740_v45 = vpop.f32.mrb[12].mxu0 }
  0xf2   :  { %v678_v46 = vpack.c.bf16 %v740_v45, %v740_v45  ;;  %v193_v47 = vpop.f32.mrb[13].mxu0 }
  0xf3   :  { %v676_v48 = vpack.c.bf16 %v193_v47, %v193_v47  ;;  %v741_v49 = vpop.f32.mrb[14].mxu0  ;;  %799 = vmatprep.mubr.msk.f32.mxu0 %vm86_vm0, %v193_v47 }
  0xf4   :  { %287 = vst.msk [vmem:[%s1152_s4 + $0x38] sm:$0xf] %vm272_vm2, %v678_v46  ;;  %v679_v50 = vpack.c.bf16 %v741_v49, %v741_v49  ;;  %v834_v51 = vpack.c.bf16 %v741_v49, %v740_v45  ;;  %v196_v52 = vpop.f32.mrb[15].mxu0 }
  0xf5   :  { %285 = vst.msk [vmem:[%s1152_s4 + $0x30] sm:$0xf] %vm272_vm2, %v676_v48  ;;  %v677_v53 = vpack.c.bf16 %v196_v52, %v196_v52  ;;  %v830_v54 = vpack.c.bf16 %v196_v52, %v193_v47  ;;  %800 = vmatmul.mubr.msk.f32.gmra.mrb[28].mxu0 %vm86_vm0, %v196_v52 }
  0xf6   :  { %288 = vst.msk [vmem:[%s1152_s4 + $0x3c] sm:$0xf] %vm272_vm2, %v679_v50  ;;  %802 = vmatprep.mubr.msk.f32.mxu0 %vm86_vm0, %v740_v45 }
  0xf7   :  { %820 = vmatpush3.bf16.xpose.msk.msra.mxu1 %vm966_vm3, %v818_v31  ;;  %286 = vst.msk [vmem:[%s1152_s4 + $0x34] sm:$0xf] %vm272_vm2, %v677_v53 }
  0xf8   :  { %821 = vmatprep.subr.bf16.mxu1 %v878_v12 }
  0xf9   :  { %803 = vmatmul.mubr.msk.f32.gmra.mrb[30].mxu0 %vm86_vm0, %v741_v49 }
  0xff   :  { %824 = vmatpush3.bf16.xpose.msk.msra.mxu1 %vm966_vm3, %v822_v44 }
 0x100   :  { %825 = vmatprep.subr.bf16.mxu1 %v878_v12 }
 0x107   :  { %828 = vmatpush3.bf16.xpose.msk.msra.mxu1 %vm966_vm3, %v826_v41 }
 0x108   :  { %829 = vmatprep.subr.bf16.mxu1 %v878_v12 }
 0x10f   :  { %832 = vmatpush3.bf16.xpose.msk.msra.mxu1 %vm966_vm3, %v830_v54 }
 0x110   :  { %833 = vmatprep.subr.bf16.mxu1 %v878_v12 }
 0x117   :  { %836 = vmatpush3.bf16.xpose.msk.msra.mxu1 %vm966_vm3, %v834_v51 }
 0x11e   :  { %775 = vmatmul.mubr.msk.f32.vlgmr.msra.gmra.mrb[0].mxu1 %vm86_vm0, %v289_v55 }
 0x1b0   :  { %v783_v56 = vpop.f32.mrb[16].mxu0 }
 0x1b1   :  { %561 = vst.msk [vmem:[%s1154_s6 + $0x8] sm:$0xff] %vm559_vm4, %v783_v56  ;;  %v480_v57 = vpop.f32.mrb[17].mxu0 }
 0x1b2   :  { %560 = vst.msk [vmem:[%s1154_s6] sm:$0xff] %vm559_vm4, %v480_v57 }
 0x1b4   :  { %v786_v58 = vpop.f32.mrb[18].mxu0 }
 0x1b5   :  { %563 = vst.msk [vmem:[%s1154_s6 + $0x18] sm:$0xff] %vm559_vm4, %v786_v58  ;;  %v490_v59 = vpop.f32.mrb[19].mxu0 }
 0x1b6   :  { %562 = vst.msk [vmem:[%s1154_s6 + $0x10] sm:$0xff] %vm559_vm4, %v490_v59 }
 0x1b8   :  { %v789_v60 = vpop.f32.mrb[20].mxu0 }
 0x1b9   :  { %565 = vst.msk [vmem:[%s1154_s6 + $0x28] sm:$0xff] %vm559_vm4, %v789_v60  ;;  %v500_v61 = vpop.f32.mrb[21].mxu0 }
 0x1ba   :  { %564 = vst.msk [vmem:[%s1154_s6 + $0x20] sm:$0xff] %vm559_vm4, %v500_v61 }
 0x1bc   :  { %v792_v62 = vpop.f32.mrb[22].mxu0 }
 0x1bd   :  { %567 = vst.msk [vmem:[%s1154_s6 + $0x38] sm:$0xff] %vm559_vm4, %v792_v62  ;;  %v510_v63 = vpop.f32.mrb[23].mxu0 }
 0x1be   :  { %566 = vst.msk [vmem:[%s1154_s6 + $0x30] sm:$0xff] %vm559_vm4, %v510_v63 }
 0x1c0   :  { %v795_v0 = vpop.f32.mrb[24].mxu0 }
 0x1c1   :  { %569 = vst.msk [vmem:[%s1154_s6 + $0x48] sm:$0xff] %vm559_vm4, %v795_v0  ;;  %v520_v1 = vpop.f32.mrb[25].mxu0 }
 0x1c2   :  { %568 = vst.msk [vmem:[%s1154_s6 + $0x40] sm:$0xff] %vm559_vm4, %v520_v1 }
 0x1c4   :  { %v798_v2 = vpop.f32.mrb[26].mxu0 }
 0x1c5   :  { %571 = vst.msk [vmem:[%s1154_s6 + $0x58] sm:$0xff] %vm559_vm4, %v798_v2  ;;  %v530_v3 = vpop.f32.mrb[27].mxu0 }
 0x1c6   :  { %570 = vst.msk [vmem:[%s1154_s6 + $0x50] sm:$0xff] %vm559_vm4, %v530_v3 }
 0x1c8   :  { %v801_v4 = vpop.f32.mrb[28].mxu0 }
 0x1c9   :  { %573 = vst.msk [vmem:[%s1154_s6 + $0x68] sm:$0xff] %vm559_vm4, %v801_v4  ;;  %v540_v5 = vpop.f32.mrb[29].mxu0 }
 0x1ca   :  { %572 = vst.msk [vmem:[%s1154_s6 + $0x60] sm:$0xff] %vm559_vm4, %v540_v5 }
 0x1cc   :  { %v804_v6 = vpop.f32.mrb[30].mxu0 }
 0x1cd   :  { %575 = vst.msk [vmem:[%s1154_s6 + $0x78] sm:$0xff] %vm559_vm4, %v804_v6  ;;  %v550_v7 = vpop.f32.mrb[31].mxu0 }
 0x1ce   :  { %574 = vst.msk [vmem:[%s1154_s6 + $0x70] sm:$0xff] %vm559_vm4, %v550_v7 }
 0x1f1   :  { %v407_v8 = vpop.f32.mrb[0].mxu1 }
 0x1f2   :  { %411 = vst [vmem:[#allocation2] sm:$0x3] %v407_v8  ;;  %v776_v9 = vpop.f32.mrb[1].mxu1 }
 0x1f3   :  { %865 = shalt.err (!%p862_p4)
}
 0x1f4   :  { %s866_s1 = scalar_lea.hbm %s1153_s5, 32 }
 0x1f5   :  { %p867_p5 = scmp.ne.s32.totalorder %s1153_s5, %s866_s1  ;;  %p870_p6 = scmp.lt.u32.totalorder %s866_s1, %s1153_s5 }
 0x1f7   :  { %p872_p7 = pnand %p870_p6, %p867_p5 }
 0x1f9   :  { %875 = shalt.err (!%p872_p7)
}
 0x1fa   :  { %587 = dma.vmem_to_hbm [thread:$0]  %s585_s26, 32, %s1153_s5, [#allocation3]  }
 0x1fb   :  { %876 = dma.done.wait [#allocation3], 32  }
 0x1fc   :  { %877 = vsyncadd [#allocation3], 4294967264 }
 0x1fd   :  { %597 = vsyncpa [#allocation3], 1 }

</bundles_post_ra>
